<compile_context>
chip_gen: v5e
topology: v5e:2x2
jax: 0.10.0
libtpu: 0.0.40
codegen_flags: <defaults>
</compile_context>

<pallas_src>
import functools

import jax
import jax.numpy as jnp
from jax.experimental import pallas as pl
from jax.experimental.pallas import tpu as pltpu

_LANE = 128
_BF16_SUBLANE = 16          # bf16 packs 16 rows per vreg sublane group
_NEG_BIG = -1e30            # bias for padded output lanes -> exp() underflows to 0


def _round_up(n, m):
    return ((n + m - 1) // m) * m


def _pad2d(a, rows, cols, fill=0.0):
    r, c = a.shape
    return jnp.pad(a, ((0, rows - r), (0, cols - c)), constant_values=fill)


# --------------------------------------------------------------------------- #
# Kernel
# --------------------------------------------------------------------------- #
def _mlp_kernel(x_ref,
                w1_ref, b1_ref,
                w2_ref, b2_ref,
                w3_ref, b3_ref,
                wo_ref, bo_ref,
                o_ref):
    """Full MLP forward for one (TILE_B, features) batch tile held in VMEM.

    Matmuls feed the MXU in bf16 with f32 accumulation; bias/ReLU run in f32
    and the ReLU output is cast back to bf16 in the same expression to keep
    the f32 live range (vreg/spill pressure) short.
    """
    # layer 0: Linear(input -> hidden) + ReLU (dropout = identity, eval mode)
    h = jnp.dot(x_ref[...], w1_ref[...], preferred_element_type=jnp.float32)
    h = jnp.maximum(h + b1_ref[...], 0.0).astype(jnp.bfloat16)

    # layer 1: Linear(hidden -> hidden) + ReLU
    h = jnp.dot(h, w2_ref[...], preferred_element_type=jnp.float32)
    h = jnp.maximum(h + b2_ref[...], 0.0).astype(jnp.bfloat16)

    # layer 2: Linear(hidden -> hidden) + ReLU
    h = jnp.dot(h, w3_ref[...], preferred_element_type=jnp.float32)
    h = jnp.maximum(h + b3_ref[...], 0.0).astype(jnp.bfloat16)

    # output layer + softmax over the feature axis (PyTorch dim=1).
    # Logits stay f32: padded output lanes carry a -1e30 bias (zero weights)
    # so exp() == 0 and they drop out of the softmax.
    logits = jnp.dot(h, wo_ref[...], preferred_element_type=jnp.float32) + bo_ref[...]
    logits = logits - jnp.max(logits, axis=-1, keepdims=True)
    p = jnp.exp(logits)
    p = p / jnp.sum(p, axis=-1, keepdims=True)      # exact: rows sum to 1
    o_ref[...] = p.astype(o_ref.dtype)


# --------------------------------------------------------------------------- #
# Parameter preparation (run ONCE, outside the per-call path)
# --------------------------------------------------------------------------- #
def prepare_params(params):
    """Pad feature dims to multiples of 128 and cast weights to bf16, once.

    Returns (prepared_param_dict, output_dim).  The prepared arrays are what
    the kernel consumes; nothing in the per-call forward path touches the raw
    f32 weights again.
    """
    in_dim, hidden_dim = params["w1"].shape
    out_dim = params["wo"].shape[1]

    in_p = _round_up(in_dim, _LANE)
    hid_p = _round_up(hidden_dim, _LANE)
    out_p = _round_up(out_dim, _LANE)

    prep = {
        "w1": _pad2d(params["w1"], in_p, hid_p).astype(jnp.bfloat16),
        "w2": _pad2d(params["w2"], hid_p, hid_p).astype(jnp.bfloat16),
        "w3": _pad2d(params["w3"], hid_p, hid_p).astype(jnp.bfloat16),
        "wo": _pad2d(params["wo"], hid_p, out_p).astype(jnp.bfloat16),
        "b1": _pad2d(params["b1"], 1, hid_p),
        "b2": _pad2d(params["b2"], 1, hid_p),
        "b3": _pad2d(params["b3"], 1, hid_p),
        # Padded output lanes: large negative bias so the softmax ignores them.
        "bo": _pad2d(params["bo"], 1, out_p, fill=_NEG_BIG),
    }
    prep = {k: jax.device_put(v) for k, v in prep.items()}
    return prep, out_dim


# --------------------------------------------------------------------------- #
# Batch tiling heuristics
# --------------------------------------------------------------------------- #
def _batch_tile_target():
    """128 on v5e (128x128 MXU, 1 vst slot); 256 on v6e/v7x."""
    try:
        kind = jax.devices()[0].device_kind.lower()
    except Exception:  # pragma: no cover - defensive
        return 256
    if "v5 lite" in kind or "v5e" in kind or "v5litepod" in kind:
        return 128
    return 256


def _pick_batch_tile(B, target):
    # bf16 activations pack 16 rows per sublane-packed vreg -> round to 16.
    b_p = _round_up(B, _BF16_SUBLANE)
    # Largest 16-aligned tile <= target that divides the padded batch exactly,
    # so we never run whole padded tiles of full 4-layer compute.
    tile_b = min(target, b_p)
    while b_p % tile_b:
        tile_b -= _BF16_SUBLANE
    # Prefer >= 2 grid steps so dimension_semantics=("parallel",) can shard
    # the batch across both v7x TensorCores (harmless on v5e/v6e).
    if b_p // tile_b == 1 and b_p >= 2 * _BF16_SUBLANE and (b_p // 2) % _BF16_SUBLANE == 0:
        tile_b = b_p // 2
    return tile_b, b_p


# --------------------------------------------------------------------------- #
# Forward
# --------------------------------------------------------------------------- #
@functools.partial(jax.jit, static_argnames=("out_dim", "out_dtype"))
def mlp_forward(x, prep, *, out_dim, out_dtype=jnp.float32):
    """x: (B, input_dim) float32.  prep: output of prepare_params()."""
    B, in_dim = x.shape
    in_p, hid_p = prep["w1"].shape
    out_p = prep["wo"].shape[1]
    assert in_dim <= in_p

    tile_b, b_p = _pick_batch_tile(B, _batch_tile_target())
    grid = (b_p // tile_b,)

    # Only the activations are padded/cast per call (B-dependent).
    x_p = _pad2d(x, b_p, in_p).astype(jnp.bfloat16)

    def resident(a):
        # Constant index_map -> DMA'd into VMEM once and resident across the
        # batch loop; single-buffered (double-buffering a constant block only
        # doubles its VMEM footprint).
        return pl.BlockSpec(a.shape, lambda i: (0, 0),
                            pipeline_mode=pl.Buffered(1))

    # VMEM budget: single-buffered resident weights/biases + double-buffered
    # x/out tiles + headroom for f32 intermediates.  Clamp to [32, 100] MiB.
    out_itemsize = jnp.dtype(out_dtype).itemsize
    weight_bytes = sum(int(a.size) * a.dtype.itemsize for a in prep.values())
    stream_bytes = 2 * tile_b * (in_p * 2 + out_p * out_itemsize)
    scratch_bytes = 6 * tile_b * max(hid_p, out_p) * 4
    vmem_limit = int(min(100 * 2**20,
                         max(32 * 2**20,
                             1.5 * (weight_bytes + stream_bytes + scratch_bytes))))

    out = pl.pallas_call(
        _mlp_kernel,
        out_shape=jax.ShapeDtypeStruct((b_p, out_p), out_dtype),
        grid=grid,
        in_specs=[
            pl.BlockSpec((tile_b, in_p), lambda i: (i, 0)),   # x: tiled over batch
            resident(prep["w1"]), resident(prep["b1"]),
            resident(prep["w2"]), resident(prep["b2"]),
            resident(prep["w3"]), resident(prep["b3"]),
            resident(prep["wo"]), resident(prep["bo"]),
        ],
        out_specs=pl.BlockSpec((tile_b, out_p), lambda i: (i, 0)),
        compiler_params=pltpu.CompilerParams(
            dimension_semantics=("parallel",),
            vmem_limit_bytes=vmem_limit,
        ),
    )(x_p, prep["w1"], prep["b1"], prep["w2"], prep["b2"],
      prep["w3"], prep["b3"], prep["wo"], prep["bo"])

    return out[:B, :out_dim]


# --------------------------------------------------------------------------- #
# Parameters & references
# --------------------------------------------------------------------------- #
def init_params(key, input_dim, hidden_dim, output_dim):
    """Deterministic synthetic parameters (PyTorch Linear shapes, stored transposed)."""
    ks = jax.random.split(key, 8)
    scale_in = 1.0 / jnp.sqrt(input_dim)
    scale_h = 1.0 / jnp.sqrt(hidden_dim)
    return {
        "w1": jax.random.uniform(ks[0], (input_dim, hidden_dim), jnp.float32,
                                 -scale_in, scale_in),
        "b1": jax.random.uniform(ks[1], (1, hidden_dim), jnp.float32,
                                 -scale_in, scale_in),
        "w2": jax.random.uniform(ks[2], (hidden_dim, hidden_dim), jnp.float32,
                                 -scale_h, scale_h),
        "b2": jax.random.uniform(ks[3], (1, hidden_dim), jnp.float32,
                                 -scale_h, scale_h),
        "w3": jax.random.uniform(ks[4], (hidden_dim, hidden_dim), jnp.float32,
                                 -scale_h, scale_h),
        "b3": jax.random.uniform(ks[5], (1, hidden_dim), jnp.float32,
                                 -scale_h, scale_h),
        "wo": jax.random.uniform(ks[6], (hidden_dim, output_dim), jnp.float32,
                                 -scale_h, scale_h),
        "bo": jax.random.uniform(ks[7], (1, output_dim), jnp.float32,
                                 -scale_h, scale_h),
    }


def mlp_reference_f32(x, params):
    """Pure-JAX f32 reference mirroring the PyTorch forward (eval mode)."""
    h = x
    for w, b in (("w1", "b1"), ("w2", "b2"), ("w3", "b3")):
        h = jnp.maximum(h @ params[w] + params[b], 0.0)
    logits = h @ params["wo"] + params["bo"]
    return jax.nn.softmax(logits, axis=1)


def mlp_reference_mixed(x, params):
    """Pure-JAX reference mirroring the kernel's bf16-matmul / f32-accum precision."""
    bf = jnp.bfloat16
    h = x.astype(bf)
    for w, b in (("w1", "b1"), ("w2", "b2"), ("w3", "b3")):
        h = jnp.dot(h, params[w].astype(bf),
                    preferred_element_type=jnp.float32) + params[b]
        h = jnp.maximum(h, 0.0).astype(bf)
    logits = jnp.dot(h, params["wo"].astype(bf),
                     preferred_element_type=jnp.float32) + params["bo"]
    return jax.nn.softmax(logits, axis=1)


if __name__ == "__main__":
    # MLP(input_dim=32, output_dim=16, num_layers=3) -> hidden_dim = 64
    batch, input_dim, output_dim = 8, 32, 16
    hidden_dim = input_dim * 2

    key = jax.random.PRNGKey(0)
    kx, kp = jax.random.split(key)
    x = jax.random.normal(kx, (batch, input_dim), jnp.float32)
    params = init_params(kp, input_dim, hidden_dim, output_dim)

    # One-time weight prep (padding + bf16 cast) hoisted out of the call path.
    prep, out_dim = prepare_params(params)

    out = mlp_forward(x, prep, out_dim=out_dim)
    out = jax.block_until_ready(out)

    assert out.shape == (batch, output_dim)

    # Tight check against a reference with the same bf16/f32 mixed precision.
    ref_mixed = mlp_reference_mixed(x, params)
    assert jnp.allclose(out, ref_mixed, atol=5e-3, rtol=5e-3), "mismatch vs mixed ref"

    # Loose check against the full-f32 reference (bf16 matmul rounding).
    ref_f32 = mlp_reference_f32(x, params)
    assert jnp.allclose(out, ref_f32, atol=2e-2, rtol=2e-2), "mismatch vs f32 ref"

    # Exact softmax division -> rows sum to 1 (f32 rounding only).
    assert jnp.allclose(jnp.sum(out, axis=1), 1.0, atol=1e-3), "row sums"

    print("KERNEL_OK")
</pallas_src>

<mosaic_0001>
module attributes {stable_mosaic.version = 11 : i64} {
  func.func @_mlp_kernel(%arg0: i32, %arg1: memref<16x128xbf16, #tpu.memory_space<vmem>>, %arg2: memref<128x128xbf16, #tpu.memory_space<vmem>>, %arg3: memref<1x128xf32, #tpu.memory_space<vmem>>, %arg4: memref<128x128xbf16, #tpu.memory_space<vmem>>, %arg5: memref<1x128xf32, #tpu.memory_space<vmem>>, %arg6: memref<128x128xbf16, #tpu.memory_space<vmem>>, %arg7: memref<1x128xf32, #tpu.memory_space<vmem>>, %arg8: memref<128x128xbf16, #tpu.memory_space<vmem>>, %arg9: memref<1x128xf32, #tpu.memory_space<vmem>>, %arg10: memref<16x128xf32, #tpu.memory_space<vmem>>) attributes {dimension_semantics = [#tpu.dimension_semantics<parallel>], iteration_bounds = array<i64: 1>, scalar_prefetch = 0 : i64, scratch_operands = 0 : i64, tpu.core_type = #tpu.core_type<tc>, window_params = [{transform_indices = @transform_0, window_bounds = array<i64: 16, 128>}, {pipeline_mode = #tpu.pipeline_mode<synchronous>, transform_indices = @transform_1, window_bounds = array<i64: 128, 128>}, {pipeline_mode = #tpu.pipeline_mode<synchronous>, transform_indices = @transform_2, window_bounds = array<i64: 1, 128>}, {pipeline_mode = #tpu.pipeline_mode<synchronous>, transform_indices = @transform_3, window_bounds = array<i64: 128, 128>}, {pipeline_mode = #tpu.pipeline_mode<synchronous>, transform_indices = @transform_4, window_bounds = array<i64: 1, 128>}, {pipeline_mode = #tpu.pipeline_mode<synchronous>, transform_indices = @transform_5, window_bounds = array<i64: 128, 128>}, {pipeline_mode = #tpu.pipeline_mode<synchronous>, transform_indices = @transform_6, window_bounds = array<i64: 1, 128>}, {pipeline_mode = #tpu.pipeline_mode<synchronous>, transform_indices = @transform_7, window_bounds = array<i64: 128, 128>}, {pipeline_mode = #tpu.pipeline_mode<synchronous>, transform_indices = @transform_8, window_bounds = array<i64: 1, 128>}, {transform_indices = @transform_9, window_bounds = array<i64: 16, 128>}]} {
    %c0 = arith.constant 0 : index
    %c0_0 = arith.constant 0 : index
    %0 = vector.load %arg1[%c0, %c0_0] : memref<16x128xbf16, #tpu.memory_space<vmem>>, vector<16x128xbf16>
    %c0_1 = arith.constant 0 : index
    %c0_2 = arith.constant 0 : index
    %1 = vector.load %arg2[%c0_1, %c0_2] : memref<128x128xbf16, #tpu.memory_space<vmem>>, vector<128x128xbf16>
    %cst = arith.constant dense<0.000000e+00> : vector<16x128xf32>
    %2 = tpu.matmul %0, %1, %cst {dimension_numbers = #tpu.dot_dimension_numbers<[1], [0], [0], [1], [0, 0, 1, 1], [], []>} : vector<16x128xbf16>, vector<128x128xbf16>, vector<16x128xf32> -> vector<16x128xf32>
    %c0_3 = arith.constant 0 : index
    %c0_4 = arith.constant 0 : index
    %3 = vector.load %arg3[%c0_3, %c0_4] : memref<1x128xf32, #tpu.memory_space<vmem>>, vector<1x128xf32>
    %4 = vector.broadcast %3 : vector<1x128xf32> to vector<16x128xf32>
    %5 = arith.addf %2, %4 : vector<16x128xf32>
    %cst_5 = arith.constant 0.000000e+00 : f32
    %6 = vector.broadcast %cst_5 : f32 to vector<16x128xf32>
    %7 = arith.maximumf %5, %6 : vector<16x128xf32>
    %8 = arith.truncf %7 : vector<16x128xf32> to vector<16x128xbf16>
    %c0_6 = arith.constant 0 : index
    %c0_7 = arith.constant 0 : index
    %9 = vector.load %arg4[%c0_6, %c0_7] : memref<128x128xbf16, #tpu.memory_space<vmem>>, vector<128x128xbf16>
    %cst_8 = arith.constant dense<0.000000e+00> : vector<16x128xf32>
    %10 = tpu.matmul %8, %9, %cst_8 {dimension_numbers = #tpu.dot_dimension_numbers<[1], [0], [0], [1], [0, 0, 1, 1], [], []>} : vector<16x128xbf16>, vector<128x128xbf16>, vector<16x128xf32> -> vector<16x128xf32>
    %c0_9 = arith.constant 0 : index
    %c0_10 = arith.constant 0 : index
    %11 = vector.load %arg5[%c0_9, %c0_10] : memref<1x128xf32, #tpu.memory_space<vmem>>, vector<1x128xf32>
    %12 = vector.broadcast %11 : vector<1x128xf32> to vector<16x128xf32>
    %13 = arith.addf %10, %12 : vector<16x128xf32>
    %cst_11 = arith.constant 0.000000e+00 : f32
    %14 = vector.broadcast %cst_11 : f32 to vector<16x128xf32>
    %15 = arith.maximumf %13, %14 : vector<16x128xf32>
    %16 = arith.truncf %15 : vector<16x128xf32> to vector<16x128xbf16>
    %c0_12 = arith.constant 0 : index
    %c0_13 = arith.constant 0 : index
    %17 = vector.load %arg6[%c0_12, %c0_13] : memref<128x128xbf16, #tpu.memory_space<vmem>>, vector<128x128xbf16>
    %cst_14 = arith.constant dense<0.000000e+00> : vector<16x128xf32>
    %18 = tpu.matmul %16, %17, %cst_14 {dimension_numbers = #tpu.dot_dimension_numbers<[1], [0], [0], [1], [0, 0, 1, 1], [], []>} : vector<16x128xbf16>, vector<128x128xbf16>, vector<16x128xf32> -> vector<16x128xf32>
    %c0_15 = arith.constant 0 : index
    %c0_16 = arith.constant 0 : index
    %19 = vector.load %arg7[%c0_15, %c0_16] : memref<1x128xf32, #tpu.memory_space<vmem>>, vector<1x128xf32>
    %20 = vector.broadcast %19 : vector<1x128xf32> to vector<16x128xf32>
    %21 = arith.addf %18, %20 : vector<16x128xf32>
    %cst_17 = arith.constant 0.000000e+00 : f32
    %22 = vector.broadcast %cst_17 : f32 to vector<16x128xf32>
    %23 = arith.maximumf %21, %22 : vector<16x128xf32>
    %24 = arith.truncf %23 : vector<16x128xf32> to vector<16x128xbf16>
    %c0_18 = arith.constant 0 : index
    %c0_19 = arith.constant 0 : index
    %25 = vector.load %arg8[%c0_18, %c0_19] : memref<128x128xbf16, #tpu.memory_space<vmem>>, vector<128x128xbf16>
    %cst_20 = arith.constant dense<0.000000e+00> : vector<16x128xf32>
    %26 = tpu.matmul %24, %25, %cst_20 {dimension_numbers = #tpu.dot_dimension_numbers<[1], [0], [0], [1], [0, 0, 1, 1], [], []>} : vector<16x128xbf16>, vector<128x128xbf16>, vector<16x128xf32> -> vector<16x128xf32>
    %c0_21 = arith.constant 0 : index
    %c0_22 = arith.constant 0 : index
    %27 = vector.load %arg9[%c0_21, %c0_22] : memref<1x128xf32, #tpu.memory_space<vmem>>, vector<1x128xf32>
    %28 = vector.broadcast %27 : vector<1x128xf32> to vector<16x128xf32>
    %29 = arith.addf %26, %28 : vector<16x128xf32>
    %cst_23 = arith.constant dense<0xFF800000> : vector<16xf32>
    %30 = vector.multi_reduction <maximumf>, %29, %cst_23 [1] : vector<16x128xf32> to vector<16xf32>
    %31 = vector.shape_cast %30 : vector<16xf32> to vector<16x1xf32>
    %32 = vector.broadcast %31 : vector<16x1xf32> to vector<16x128xf32>
    %33 = arith.subf %29, %32 : vector<16x128xf32>
    %34 = math.exp %33 : vector<16x128xf32>
    %cst_24 = arith.constant dense<0.000000e+00> : vector<16xf32>
    %35 = vector.multi_reduction <add>, %34, %cst_24 [1] : vector<16x128xf32> to vector<16xf32>
    %36 = vector.shape_cast %35 : vector<16xf32> to vector<16x1xf32>
    %37 = vector.broadcast %36 : vector<16x1xf32> to vector<16x128xf32>
    %38 = arith.divf %34, %37 : vector<16x128xf32>
    %c0_25 = arith.constant 0 : index
    %c0_26 = arith.constant 0 : index
    %39 = vector.load %arg10[%c0_25, %c0_26] : memref<16x128xf32, #tpu.memory_space<vmem>>, vector<16x128xf32>
    tpu.vector_store %arg10[%c0_25, %c0_26], %38 {strides = array<i32>} : memref<16x128xf32, #tpu.memory_space<vmem>>, vector<16x128xf32>,
    return
  }
  func.func @transform_0(%arg0: i32) -> (i32, i32) {
    %c0_i32 = arith.constant 0 : i32
    %c0_i32_0 = arith.constant 0 : i32
    return %arg0, %c0_i32 : i32, i32
  }
  func.func @transform_1(%arg0: i32) -> (i32, i32) {
    %c0_i32 = arith.constant 0 : i32
    %c0_i32_0 = arith.constant 0 : i32
    %c0_i32_1 = arith.constant 0 : i32
    return %c0_i32, %c0_i32_0 : i32, i32
  }
  func.func @transform_2(%arg0: i32) -> (i32, i32) {
    %c0_i32 = arith.constant 0 : i32
    %c0_i32_0 = arith.constant 0 : i32
    %c0_i32_1 = arith.constant 0 : i32
    return %c0_i32, %c0_i32_0 : i32, i32
  }
  func.func @transform_3(%arg0: i32) -> (i32, i32) {
    %c0_i32 = arith.constant 0 : i32
    %c0_i32_0 = arith.constant 0 : i32
    %c0_i32_1 = arith.constant 0 : i32
    return %c0_i32, %c0_i32_0 : i32, i32
  }
  func.func @transform_4(%arg0: i32) -> (i32, i32) {
    %c0_i32 = arith.constant 0 : i32
    %c0_i32_0 = arith.constant 0 : i32
    %c0_i32_1 = arith.constant 0 : i32
    return %c0_i32, %c0_i32_0 : i32, i32
  }
  func.func @transform_5(%arg0: i32) -> (i32, i32) {
    %c0_i32 = arith.constant 0 : i32
    %c0_i32_0 = arith.constant 0 : i32
    %c0_i32_1 = arith.constant 0 : i32
    return %c0_i32, %c0_i32_0 : i32, i32
  }
  func.func @transform_6(%arg0: i32) -> (i32, i32) {
    %c0_i32 = arith.constant 0 : i32
    %c0_i32_0 = arith.constant 0 : i32
    %c0_i32_1 = arith.constant 0 : i32
    return %c0_i32, %c0_i32_0 : i32, i32
  }
  func.func @transform_7(%arg0: i32) -> (i32, i32) {
    %c0_i32 = arith.constant 0 : i32
    %c0_i32_0 = arith.constant 0 : i32
    %c0_i32_1 = arith.constant 0 : i32
    return %c0_i32, %c0_i32_0 : i32, i32
  }
  func.func @transform_8(%arg0: i32) -> (i32, i32) {
    %c0_i32 = arith.constant 0 : i32
    %c0_i32_0 = arith.constant 0 : i32
    %c0_i32_1 = arith.constant 0 : i32
    return %c0_i32, %c0_i32_0 : i32, i32
  }
  func.func @transform_9(%arg0: i32) -> (i32, i32) {
    %c0_i32 = arith.constant 0 : i32
    %c0_i32_0 = arith.constant 0 : i32
    return %arg0, %c0_i32 : i32, i32
  }
}

</mosaic_0001>

<bundles_post_ra>
// kernel: mlp_forward.1
= control target key start
LH: loop header
LB: loop body
LE: loop exit
PB: predicated region body
PF: predicated region fallthrough
CT: control target
= control target key end

     0   :  { %14 = vsyncpa [#allocation3], 0  ;;  %s867_s0 = inlined_call_operand.vmem [shape: bf16[16,128], index: 0, kind: input, shape index: {}]   ;;  %s868_s1 = inlined_call_operand.hbm [shape: bf16[128,128], index: 1, kind: input, shape index: {}]   ;;  %s869_s2 = inlined_call_operand.vmem [shape: f32[1,128], index: 2, kind: input, shape index: {}]   ;;  %s870_s3 = inlined_call_operand.hbm [shape: bf16[128,128], index: 3, kind: input, shape index: {}]   ;;  %s871_s4 = inlined_call_operand.vmem [shape: f32[1,128], index: 4, kind: input, shape index: {}]   ;;  %s872_s5 = inlined_call_operand.hbm [shape: bf16[128,128], index: 5, kind: input, shape index: {}]   ;;  %s873_s6 = inlined_call_operand.vmem [shape: f32[1,128], index: 6, kind: input, shape index: {}]   ;;  %s874_s7 = inlined_call_operand.hbm [shape: bf16[128,128], index: 7, kind: input, shape index: {}]   ;;  %s875_s8 = inlined_call_operand.vmem [shape: f32[1,128], index: 8, kind: input, shape index: {}]   ;;  %s876_s9 = inlined_call_operand.vmem [shape: f32[16,128], index: 9, kind: output, shape index: {}]  }
   0x1   :  { %15 = vsyncpa [#allocation5], 0 }
   0x2   :  { %16 = vsyncpa [#allocation8], 0  ;;  %s38_s11 = sshll.u32 %s870_s3, 4  ;;  %s778_s12 = smov [#allocation4]   ;;  %s39_s11 = int_to_ptr.hbm [resolvable:$true] %s38_s11 }
   0x3   :  { %s40_s13 = sshll.u32 %s778_s12, 4  ;;  %s23_s16 = sshll.u32 %s868_s1, 4  ;;  %s41_s13 = int_to_ptr.vmem [resolvable:$true] %s40_s13  ;;  %s24_s16 = int_to_ptr.hbm [resolvable:$true] %s23_s16 }
   0x4   :  { %s779_s17 = smov 64   ;;  %s780_s18 = smov 4  }
   0x5   :  { %46 = dma.hbm_to_vmem [thread:$0]  %s39_s11, 1024, %s41_s13, [#allocation5], %s779_s17, %s779_s17, %s780_s18  }
   0x6   :  { %s781_s19 = smov [#allocation2]   ;;  %s53_s23 = sshll.u32 %s872_s5, 4  ;;  %s54_s23 = int_to_ptr.hbm [resolvable:$true] %s53_s23 }
   0x7   :  { %s25_s20 = sshll.u32 %s781_s19, 4  ;;  %s68_s25 = sshll.u32 %s874_s7, 4  ;;  %s26_s20 = int_to_ptr.vmem [resolvable:$true] %s25_s20  ;;  %s69_s25 = int_to_ptr.hbm [resolvable:$true] %s68_s25 }
   0x8   :  { %31 = dma.hbm_to_vmem [thread:$0]  %s24_s16, 1024, %s26_s20, [#allocation3], %s779_s17, %s779_s17, %s780_s18  }
   0x9   :  { %s782_s26 = smov [#allocation6]   ;;  %s783_s1 = smov [#allocation7]  }
   0xa   :  { %s55_s27 = sshll.u32 %s782_s26, 4  ;;  %s70_s28 = sshll.u32 %s783_s1, 4  ;;  %s56_s27 = int_to_ptr.vmem [resolvable:$true] %s55_s27  ;;  %s71_s28 = int_to_ptr.vmem [resolvable:$true] %s70_s28 }
   0xb   :  { %61 = dma.hbm_to_vmem [thread:$0]  %s54_s23, 1024, %s56_s27, [#allocation5], %s779_s17, %s779_s17, %s780_s18  }
   0xc   :  { %76 = dma.hbm_to_vmem [thread:$0]  %s69_s25, 1024, %s71_s28, [#allocation8], %s779_s17, %s779_s17, %s780_s18  }
   0xd   :  { %772 = dma.done.wait [#allocation3], 1024  }
   0xe   :  { %773 = vsyncadd [#allocation3], 4294966272 }
   0xf   :  { %774 = dma.done.wait [#allocation5], 2048  }
  0x10   :  { %775 = vsyncadd [#allocation5], 4294965248 }
  0x11   :  { %776 = dma.done.wait [#allocation8], 1024  }
  0x12   :  { %777 = vsyncadd [#allocation8], 4294966272  ;;  %v633_v0 = vld [vmem:[#allocation2 + $0x38] sm:$0xff]  ;;  %v632_v1 = vld [vmem:[#allocation2 + $0x30] sm:$0xff] }
  0x13   :  { %171 = vmatpush.bf16.msra.mxu0 %v633_v0  ;;  %v641_v2 = vld [vmem:[#allocation4 + $0x38] sm:$0xff]  ;;  %v640_v3 = vld [vmem:[#allocation4 + $0x30] sm:$0xff]  ;;  %v631_v4 = vld [vmem:[#allocation2 + $0x28] sm:$0xff] }
  0x14   :  { %256 = vmatpush.bf16.msra.mxu1 %v641_v2  ;;  %v639_v5 = vld [vmem:[#allocation4 + $0x28] sm:$0xff]  ;;  %v630_v6 = vld [vmem:[#allocation2 + $0x20] sm:$0xff]  ;;  %v629_v8 = vld [vmem:[#allocation2 + $0x18] sm:$0xff] }
  0x15   :  { %v638_v7 = vld [vmem:[#allocation4 + $0x20] sm:$0xff]  ;;  %v628_v9 = vld [vmem:[#allocation2 + $0x10] sm:$0xff]  ;;  %v627_v10 = vld [vmem:[#allocation2 + $0x8] sm:$0xff] }
  0x16   :  { %v626_v11 = vld [vmem:[#allocation2] sm:$0xff]  ;;  %v637_v13 = vld [vmem:[#allocation4 + $0x18] sm:$0xff]  ;;  %v636_v14 = vld [vmem:[#allocation4 + $0x10] sm:$0xff] }
  0x17   :  { %172 = vmatpush.bf16.msra.mxu0 %v632_v1  ;;  %v625_v12 = vld [vmem:[%s867_s0] sm:$0xff]  ;;  %v635_v15 = vld [vmem:[#allocation4 + $0x8] sm:$0xff]  ;;  %v649_v17 = vld [vmem:[#allocation6 + $0x38] sm:$0xff] }
  0x18   :  { %257 = vmatpush.bf16.msra.mxu1 %v640_v3  ;;  %v634_v16 = vld [vmem:[#allocation4] sm:$0xff]  ;;  %341 = vmatpush.bf16.msra.mxu2 %v649_v17  ;;  %v648_v18 = vld [vmem:[#allocation6 + $0x30] sm:$0xff]  ;;  %v647_v19 = vld [vmem:[#allocation6 + $0x28] sm:$0xff] }
  0x19   :  { %v646_v20 = vld [vmem:[#allocation6 + $0x20] sm:$0xff]  ;;  %v645_v29 = vld [vmem:[#allocation6 + $0x18] sm:$0xff]  ;;  %v644_v30 = vld [vmem:[#allocation6 + $0x10] sm:$0xff] }
  0x1a   :  { %v664_v22 = vld [vmem:[%s869_s2] ss:$0 sm:$0xff]  ;;  %v643_v31 = vld [vmem:[#allocation6 + $0x8] sm:$0xff]  ;;  %v657_v33 = vld [vmem:[#allocation7 + $0x38] sm:$0xff] }
  0x1b   :  { %173 = vmatpush.bf16.msra.mxu0 %v631_v4  ;;  %v642_v32 = vld [vmem:[#allocation6] sm:$0xff]  ;;  %426 = vmatpush.bf16.msra.mxu3 %v657_v33  ;;  %v656_v34 = vld [vmem:[#allocation7 + $0x30] sm:$0xff]  ;;  %v655_v35 = vld [vmem:[#allocation7 + $0x28] sm:$0xff] }
  0x1c   :  { %258 = vmatpush.bf16.msra.mxu1 %v639_v5  ;;  %342 = vmatpush.bf16.msra.mxu2 %v648_v18  ;;  %v654_v36 = vld [vmem:[#allocation7 + $0x20] sm:$0xff]  ;;  %v653_v45 = vld [vmem:[#allocation7 + $0x18] sm:$0xff]  ;;  %v652_v46 = vld [vmem:[#allocation7 + $0x10] sm:$0xff] }
  0x1d   :  { %v665_v38 = vld [vmem:[%s871_s4] ss:$0 sm:$0xff]  ;;  %v651_v47 = vld [vmem:[#allocation7 + $0x8] sm:$0xff] }
  0x1e   :  { %v650_v48 = vld [vmem:[#allocation7] sm:$0xff] }
  0x1f   :  { %174 = vmatpush.bf16.msra.mxu0 %v630_v6  ;;  %427 = vmatpush.bf16.msra.mxu3 %v656_v34  ;;  %v666_v50 = vld [vmem:[%s873_s6] ss:$0 sm:$0xff] }
  0x20   :  { %259 = vmatpush.bf16.msra.mxu1 %v638_v7  ;;  %343 = vmatpush.bf16.msra.mxu2 %v647_v19  ;;  %v667_v57 = vld [vmem:[%s875_s8] ss:$0 sm:$0xff] }
  0x23   :  { %175 = vmatpush.bf16.msra.mxu0 %v629_v8  ;;  %428 = vmatpush.bf16.msra.mxu3 %v655_v35 }
  0x24   :  { %260 = vmatpush.bf16.msra.mxu1 %v637_v13  ;;  %344 = vmatpush.bf16.msra.mxu2 %v646_v20 }
  0x27   :  { %176 = vmatpush.bf16.msra.mxu0 %v628_v9  ;;  %429 = vmatpush.bf16.msra.mxu3 %v654_v36 }
  0x28   :  { %261 = vmatpush.bf16.msra.mxu1 %v636_v14  ;;  %345 = vmatpush.bf16.msra.mxu2 %v645_v29 }
  0x2b   :  { %177 = vmatpush.bf16.msra.mxu0 %v627_v10  ;;  %430 = vmatpush.bf16.msra.mxu3 %v653_v45 }
  0x2c   :  { %262 = vmatpush.bf16.msra.mxu1 %v635_v15  ;;  %346 = vmatpush.bf16.msra.mxu2 %v644_v30 }
  0x2f   :  { %178 = vmatpush.bf16.msra.mxu0 %v626_v11  ;;  %431 = vmatpush.bf16.msra.mxu3 %v652_v46 }
  0x30   :  { %263 = vmatpush.bf16.msra.mxu1 %v634_v16  ;;  %347 = vmatpush.bf16.msra.mxu2 %v643_v31 }
  0x32   :  { %179 = vmatmul.bf16.vlgmr.msra.gmra.mxu0 %v625_v12 }
  0x33   :  { %432 = vmatpush.bf16.msra.mxu3 %v651_v47 }
  0x34   :  { %348 = vmatpush.bf16.msra.mxu2 %v642_v32 }
  0x37   :  { %433 = vmatpush.bf16.msra.mxu3 %v650_v48 }
  0xaf   :  { %v180_v21 = vpop.f32.mrf.mxu0 }
  0xb0   :  { %v181_v23 = vadd.f32 %v664_v22, %v180_v21 }
  0xb2   :  { %v185_v26 = vmax.f32 %v181_v23, 0.0 }
  0xb7   :  { %v182_v24 = vpop.f32.mrf.mxu0 }
  0xb8   :  { %v183_v25 = vadd.f32 %v664_v22, %v182_v24 }
  0xba   :  { %v186_v27 = vmax.f32 %v183_v25, 0.0 }
  0xbc   :  { %v187_v28 = vpack.c.bf16 %v186_v27, %v185_v26 }
  0xbe   :  { %264 = vmatmul.bf16.vlgmr.msra.gmra.mxu1 %v187_v28 }
 0x13b   :  { %v265_v37 = vpop.f32.mrf.mxu1 }
 0x13c   :  { %v266_v39 = vadd.f32 %v665_v38, %v265_v37 }
 0x13e   :  { %v270_v42 = vmax.f32 %v266_v39, 0.0 }
 0x143   :  { %v267_v40 = vpop.f32.mrf.mxu1 }
 0x144   :  { %v268_v41 = vadd.f32 %v665_v38, %v267_v40 }
 0x146   :  { %v271_v43 = vmax.f32 %v268_v41, 0.0 }
 0x148   :  { %v272_v44 = vpack.c.bf16 %v271_v43, %v270_v42 }
 0x14a   :  { %349 = vmatmul.bf16.vlgmr.msra.gmra.mxu2 %v272_v44 }
 0x1cd   :  { %v350_v49 = vpop.f32.mrf.mxu2 }
 0x1ce   :  { %v351_v51 = vadd.f32 %v666_v50, %v350_v49 }
 0x1d0   :  { %v355_v54 = vmax.f32 %v351_v51, 0.0 }
 0x1d5   :  { %v352_v52 = vpop.f32.mrf.mxu2 }
 0x1d6   :  { %v353_v53 = vadd.f32 %v666_v50, %v352_v52 }
 0x1d8   :  { %v356_v55 = vmax.f32 %v353_v53, 0.0 }
 0x1da   :  { %v357_v56 = vpack.c.bf16 %v356_v55, %v355_v54 }
 0x1dc   :  { %434 = vmatmul.bf16.vlgmr.msra.gmra.mxu3 %v357_v56 }
 0x25f   :  { %v435_v58 = vpop.f32.mrf.mxu3 }
 0x260   :  { %v436_v59 = vadd.f32 %v667_v57, %v435_v58 }
 0x262   :  { %440 = vmax.xlane.f32.xlu0 %v436_v59 }
 0x267   :  { %v437_v60 = vpop.f32.mrf.mxu3 }
 0x268   :  { %v438_v61 = vadd.f32 %v667_v57, %v437_v60 }
 0x26a   :  { %442 = vmax.xlane.f32.xlu0 %v438_v61 }
 0x2d5   :  { %v441_v62 = vpop.xlane.xlu0 %440 }
 0x2d6   :  { %v444_v63 = vsub.f32 %v436_v59, %v441_v62 }
 0x2d8   :  { %v446_v0 = vmul.f32 1.442695, %v444_v63 }
 0x2da   :  { %668 = vpow2.f32 %v446_v0 }
 0x2dd   :  { %v443_v1 = vpop.xlane.xlu0 %442 }
 0x2de   :  { %v445_v2 = vsub.f32 %v438_v61, %v443_v1 }
 0x2e0   :  { %v669_v3 = vpop.eup %668  ;;  %v448_v4 = vmul.f32 1.442695, %v445_v2 }
 0x2e1   :  { %450 = vadd.xlane.f32.xlu1 %v669_v3 }
 0x2e2   :  { %670 = vpow2.f32 %v448_v4 }
 0x2e8   :  { %v671_v5 = vpop.eup %670 }
 0x2e9   :  { %452 = vadd.xlane.f32.xlu1 %v671_v5 }
 0x354   :  { %v451_v6 = vpop.xlane.xlu1 %450 }
 0x355   :  { %672 = vrcp.f32 %v451_v6  ;;  %v465_v11 = vand.u32 2147483648, %v451_v6  ;;  %v463_v13 = vand.u32 2147483647, %v451_v6  ;;  %vm459_vm1 = vweird.f32 %v451_v6 }
 0x357   :  { %v466_v16 = vor.u32 1.1754944e-38, %v465_v11  ;;  %vm464_vm3 = vcmp.eq.f32.partialorder %v463_v13, 8.507059e+37 }
 0x35b   :  { %v673_v7 = vpop.eup %672 }
 0x35c   :  { %v455_v8 = vmul.f32 %v673_v7, %v451_v6  ;;  %v453_v9 = vpop.xlane.xlu1 %452  ;;  %vm460_vm0 = vweird.f32 %v673_v7 }
 0x35d   :  { %674 = vrcp.f32 %v453_v9  ;;  %vm461_vm2 = vmor %vm459_vm1, %vm460_vm0  ;;  %v480_v22 = vand.u32 2147483648, %v453_v9  ;;  %v478_v24 = vand.u32 2147483647, %v453_v9  ;;  %vm474_vm5 = vweird.f32 %v453_v9 }
 0x35e   :  { %v456_v10 = vsub.f32 1.0, %v455_v8 }
 0x35f   :  { %v481_v26 = vor.u32 1.1754944e-38, %v480_v22  ;;  %vm479_vm7 = vcmp.eq.f32.partialorder %v478_v24, 8.507059e+37 }
 0x360   :  { %v457_v12 = vmul.f32 %v673_v7, %v456_v10 }
 0x362   :  { %v458_v14 = vadd.f32 %v673_v7, %v457_v12 }
 0x363   :  { %v675_v15 = vpop.eup %674 }
 0x364   :  { %v462_v17 = vsel %vm461_vm2, %v673_v7, %v458_v14  ;;  %v470_v18 = vmul.f32 %v675_v15, %v453_v9  ;;  %vm475_vm4 = vweird.f32 %v675_v15 }
 0x365   :  { %v467_v19 = vsel %vm464_vm3, %v466_v16, %v462_v17  ;;  %vm476_vm6 = vmor %vm474_vm5, %vm475_vm4 }
 0x366   :  { %v468_v20 = vmul.f32 %v669_v3, %v467_v19  ;;  %v471_v21 = vsub.f32 1.0, %v470_v18 }
 0x368   :  { %484 = vst [vmem:[%s876_s9] sm:$0xff] %v468_v20  ;;  %v472_v23 = vmul.f32 %v675_v15, %v471_v21 }
 0x36a   :  { %v473_v25 = vadd.f32 %v675_v15, %v472_v23 }
 0x36c   :  { %v477_v27 = vsel %vm476_vm6, %v675_v15, %v473_v25 }
 0x36d   :  { %v482_v28 = vsel %vm479_vm7, %v481_v26, %v477_v27 }
 0x36e   :  { %v483_v29 = vmul.f32 %v671_v5, %v482_v28 }
 0x370   :  { %485 = vst [vmem:[%s876_s9 + $0x8] sm:$0xff] %v483_v29 }
 0x371   :  { %490 = vsyncpa [#allocation3], 1 }
 0x372   :  { %491 = vsyncpa [#allocation5], 1 }
 0x373   :  { %492 = vsyncpa [#allocation8], 1 }

</bundles_post_ra>
